<compile_context>
chip_gen: v5e
topology: v5e:2x2
jax: 0.10.0
libtpu: 0.0.40
codegen_flags: <defaults>
</compile_context>

<pallas_src>
import math

import jax
import jax.numpy as jnp
from jax.experimental import pallas as pl
from jax.experimental.pallas import tpu as pltpu

NODE_EMB = 32
NUM_NODE_TYPES = 6
HEAD_HID = 16 + 16 + 64          # fused head hidden width  (node | continue | critic)
HEAD_OUT = NUM_NODE_TYPES + 2    # fused head output rows:  6 probs | 1 continue | 1 value

# MACs*2 per sample: trunk (32->128->128->32) + fused heads (32->96->8)
FLOPS_PER_SAMPLE = 2 * (NODE_EMB * 128 + 128 * 128 + 128 * 32
                        + 32 * HEAD_HID + HEAD_HID * HEAD_OUT)


def _actor_critic_kernel(
    x_ref,                                   # [Bt, 32]  (batch rows, padded)
    w1_ref, b1_ref, w2_ref, b2_ref, w3_ref, b3_ref,   # trunk: bf16 [out,in], f32 [out,1]
    wh_ref, bh_ref,                          # fused head layer 1: bf16 [96, 32], f32 [96, 1]
    wo_ref, bo_ref,                          # fused head layer 2 (block-diag): f32 [8, 96], [8, 1]
    out_ref,                                 # [8, Bt]  rows = 6 probs | sigmoid | value
):
    # in-kernel transpose puts the batch on lanes; XLU work, hidden behind MXU
    xT = x_ref[...].T                                          # [32, Bt] f32

    def linear_bf16(w_ref, b_ref, h):
        # bf16 MXU matmul, f32 accumulate; bias add / activation stay f32
        return jnp.dot(w_ref[...], h.astype(jnp.bfloat16),
                       preferred_element_type=jnp.float32) + b_ref[...]

    # actor trunk: 32 -> 128 -> 128 -> 32, ReLU after each
    h = jnp.maximum(linear_bf16(w1_ref, b1_ref, xT), 0.0)      # [128, Bt]
    h = jnp.maximum(linear_bf16(w2_ref, b2_ref, h), 0.0)       # [128, Bt]
    af = jnp.maximum(linear_bf16(w3_ref, b3_ref, h), 0.0)      # [32, Bt]

    # fused heads: (node_type 32->16, continue 32->16, critic 32->64) as one GEMM,
    # then one tiny block-diagonal f32 GEMM producing all 8 output rows at once.
    hh = jnp.maximum(linear_bf16(wh_ref, bh_ref, af), 0.0)     # [96, Bt]
    z = jnp.dot(wo_ref[...], hh,
                preferred_element_type=jnp.float32) + bo_ref[...]   # [8, Bt]

    # per-row post-processing as full-vreg VPU ops on the [8, Bt] tile
    row = jax.lax.broadcasted_iota(jnp.int32, z.shape, 0)
    is_nt = row < NUM_NODE_TYPES                               # rows 0..5: node-type logits
    neg_inf = jnp.float32(-1e30)

    nt_masked = jnp.where(is_nt, z, neg_inf)
    nt_max = jnp.max(nt_masked, axis=0, keepdims=True)         # [1, Bt]
    nt_exp = jnp.exp(nt_masked - nt_max)                       # masked rows -> 0
    nt_sum = jnp.sum(nt_exp, axis=0, keepdims=True)            # [1, Bt]
    probs = nt_exp / nt_sum                                    # exact divide: sums to 1

    sig = jax.nn.sigmoid(z)                                    # row 6: continue prob
    out_ref[...] = jnp.where(is_nt, probs,
                             jnp.where(row == NUM_NODE_TYPES, sig, z))


def pack_params(params):
    """Pack per-layer PyTorch-style params into the fused kernel operands."""
    (w1, b1, w2, b2, w3, b3,
     wn1, bn1, wn2, bn2,
     wc1, bc1, wc2, bc2,
     wv1, bv1, wv2, bv2) = params

    def col(b):
        return b.reshape(-1, 1).astype(jnp.float32)

    def bf16(w):
        return w.astype(jnp.bfloat16)

    # fused head layer 1:  [16+16+64, 32]
    wh = jnp.concatenate([wn1, wc1, wv1], axis=0)
    bh = jnp.concatenate([bn1, bc1, bv1], axis=0).reshape(-1, 1).astype(jnp.float32)

    # fused head layer 2: block-diagonal [8, 96], kept f32 (tiny, precision-sensitive)
    wo = jnp.zeros((HEAD_OUT, HEAD_HID), jnp.float32)
    wo = wo.at[0:NUM_NODE_TYPES, 0:16].set(wn2)
    wo = wo.at[NUM_NODE_TYPES:NUM_NODE_TYPES + 1, 16:32].set(wc2)
    wo = wo.at[NUM_NODE_TYPES + 1:NUM_NODE_TYPES + 2, 32:96].set(wv2)
    bo = jnp.concatenate([bn2, bc2, bv2], axis=0).reshape(-1, 1).astype(jnp.float32)

    return (bf16(w1), col(b1), bf16(w2), col(b2), bf16(w3), col(b3),
            bf16(wh), bh, wo, bo)


def _round_up(n, m):
    return ((n + m - 1) // m) * m


def _choose_batch_tile(B):
    # lane-width floor 128 (tiny batches); up to 1024 lanes per grid step to
    # amortize per-step overhead / MXU push-drain latency on large batches.
    return min(1024, max(128, _round_up(B, 128)))


def actor_critic_forward(x, params, *, batch_tile=None):
    """x: [B, NODE_EMB] float32.  Returns (node_type_probs, continue_prob, state_value)."""
    B, D = x.shape
    assert D == NODE_EMB
    if batch_tile is None:
        batch_tile = _choose_batch_tile(B)
    assert batch_tile % 128 == 0, "batch_tile must be a multiple of 128 (lane width)"

    kparams = pack_params(params)

    # pad the ragged tail (rows only; no wrapper-side transpose)
    B_pad = _round_up(B, batch_tile)
    x_pad = x.astype(jnp.float32)
    if B_pad != B:
        x_pad = jnp.pad(x_pad, ((0, B_pad - B), (0, 0)))      # [B_pad, 32]

    grid = (B_pad // batch_tile,)

    def full_spec(arr):
        return pl.BlockSpec(arr.shape, lambda i: (0, 0))

    in_specs = [pl.BlockSpec((batch_tile, NODE_EMB), lambda i: (i, 0))] \
             + [full_spec(a) for a in kparams]
    out_spec = pl.BlockSpec((HEAD_OUT, batch_tile), lambda i: (0, i))

    weight_bytes = sum(int(a.size) * a.dtype.itemsize for a in kparams)
    cost = pl.CostEstimate(
        flops=FLOPS_PER_SAMPLE * B_pad,
        transcendentals=8 * B_pad,                              # exp rows + sigmoid
        bytes_accessed=int(x_pad.size) * 4 + HEAD_OUT * B_pad * 4 + weight_bytes,
    )

    out = pl.pallas_call(
        _actor_critic_kernel,
        out_shape=jax.ShapeDtypeStruct((HEAD_OUT, B_pad), jnp.float32),
        grid_spec=pltpu.PrefetchScalarGridSpec(
            num_scalar_prefetch=0,
            grid=grid,
            in_specs=in_specs,
            out_specs=out_spec,
        ),
        compiler_params=pltpu.CompilerParams(
            dimension_semantics=("parallel",),   # lets v7x split tiles across its 2 TCs
        ),
        cost_estimate=cost,
    )(x_pad, *kparams)

    out = out[:, :B].T                               # [B, 8]
    probs = out[:, 0:NUM_NODE_TYPES]
    cont = out[:, NUM_NODE_TYPES:NUM_NODE_TYPES + 1]
    value = out[:, NUM_NODE_TYPES + 1:NUM_NODE_TYPES + 2]
    return probs, cont, value


def init_params(key):
    """Deterministic PyTorch-style init: U(-1/sqrt(fan_in), ..), weights [out, in]."""
    dims = [
        (NODE_EMB, 128), (128, 128), (128, 32),        # actor trunk
        (32, 16), (16, NUM_NODE_TYPES),                # node_type_head
        (32, 16), (16, 1),                             # continue_head
        (32, 64), (64, 1),                             # critic
    ]
    params = []
    for fan_in, fan_out in dims:
        key, kw, kb = jax.random.split(key, 3)
        bound = 1.0 / math.sqrt(fan_in)
        w = jax.random.uniform(kw, (fan_out, fan_in), jnp.float32, -bound, bound)
        b = jax.random.uniform(kb, (fan_out,), jnp.float32, -bound, bound)
        params.append(w)
        params.append(b)
    return tuple(params)


def reference_forward(x, params):
    (w1, b1, w2, b2, w3, b3,
     wn1, bn1, wn2, bn2,
     wc1, bc1, wc2, bc2,
     wv1, bv1, wv2, bv2) = params
    relu = jax.nn.relu
    af = relu(relu(relu(x @ w1.T + b1) @ w2.T + b2) @ w3.T + b3)
    nt = jax.nn.softmax(relu(af @ wn1.T + bn1) @ wn2.T + bn2, axis=-1)
    cp = jax.nn.sigmoid(relu(af @ wc1.T + bc1) @ wc2.T + bc2)
    sv = relu(af @ wv1.T + bv1) @ wv2.T + bv2
    return nt, cp, sv


if __name__ == "__main__":
    key = jax.random.PRNGKey(0)
    key, kx = jax.random.split(key)

    B = 8  # small batch of node embeddings (padded to one 128-wide lane tile internally)
    x = jax.random.normal(kx, (B, NODE_EMB), jnp.float32)
    params = init_params(key)

    probs, cont, value = actor_critic_forward(x, params)
    jax.block_until_ready((probs, cont, value))

    ref_probs, ref_cont, ref_value = reference_forward(x, params)
    assert probs.shape == (B, NUM_NODE_TYPES)
    assert cont.shape == (B, 1)
    assert value.shape == (B, 1)
    # bf16 MXU matmuls in the trunk -> modest tolerances vs the f32 reference
    assert jnp.allclose(probs, ref_probs, atol=2e-2)
    assert jnp.allclose(cont, ref_cont, atol=2e-2)
    assert jnp.allclose(value, ref_value, atol=5e-2, rtol=5e-2)
    # exact softmax divide: probabilities sum to 1 within f32 rounding
    assert jnp.allclose(jnp.sum(probs, axis=-1), 1.0, atol=1e-5)

    # also exercise the ragged-batch padding path and a multi-step (2-tile) grid
    B2 = 300
    x2 = jax.random.normal(jax.random.PRNGKey(1), (B2, NODE_EMB), jnp.float32)
    p2, c2, v2 = actor_critic_forward(x2, params, batch_tile=256)
    jax.block_until_ready((p2, c2, v2))
    rp2, rc2, rv2 = reference_forward(x2, params)
    assert jnp.allclose(p2, rp2, atol=2e-2)
    assert jnp.allclose(c2, rc2, atol=2e-2)
    assert jnp.allclose(v2, rv2, atol=5e-2, rtol=5e-2)
    assert jnp.allclose(jnp.sum(p2, axis=-1), 1.0, atol=1e-5)

    print("KERNEL_OK")
</pallas_src>

<mosaic_0001>
module attributes {stable_mosaic.version = 11 : i64} {
  func.func @_actor_critic_kernel(%arg0: i32, %arg1: memref<128x32xf32, #tpu.memory_space<vmem>>, %arg2: memref<128x32xbf16, #tpu.memory_space<vmem>>, %arg3: memref<128x1xf32, #tpu.memory_space<vmem>>, %arg4: memref<128x128xbf16, #tpu.memory_space<vmem>>, %arg5: memref<128x1xf32, #tpu.memory_space<vmem>>, %arg6: memref<32x128xbf16, #tpu.memory_space<vmem>>, %arg7: memref<32x1xf32, #tpu.memory_space<vmem>>, %arg8: memref<96x32xbf16, #tpu.memory_space<vmem>>, %arg9: memref<96x1xf32, #tpu.memory_space<vmem>>, %arg10: memref<8x96xf32, #tpu.memory_space<vmem>>, %arg11: memref<8x1xf32, #tpu.memory_space<vmem>>, %arg12: memref<8x128xf32, #tpu.memory_space<vmem>>) attributes {dimension_semantics = [#tpu.dimension_semantics<parallel>], iteration_bounds = array<i64: 1>, scalar_prefetch = 0 : i64, scratch_operands = 0 : i64, tpu.core_type = #tpu.core_type<tc>, window_params = [{transform_indices = @transform_0, window_bounds = array<i64: 128, 32>}, {pipeline_mode = #tpu.pipeline_mode<synchronous>, transform_indices = @transform_1, window_bounds = array<i64: 128, 32>}, {pipeline_mode = #tpu.pipeline_mode<synchronous>, transform_indices = @transform_2, window_bounds = array<i64: 128, 1>}, {pipeline_mode = #tpu.pipeline_mode<synchronous>, transform_indices = @transform_3, window_bounds = array<i64: 128, 128>}, {pipeline_mode = #tpu.pipeline_mode<synchronous>, transform_indices = @transform_4, window_bounds = array<i64: 128, 1>}, {pipeline_mode = #tpu.pipeline_mode<synchronous>, transform_indices = @transform_5, window_bounds = array<i64: 32, 128>}, {pipeline_mode = #tpu.pipeline_mode<synchronous>, transform_indices = @transform_6, window_bounds = array<i64: 32, 1>}, {pipeline_mode = #tpu.pipeline_mode<synchronous>, transform_indices = @transform_7, window_bounds = array<i64: 96, 32>}, {pipeline_mode = #tpu.pipeline_mode<synchronous>, transform_indices = @transform_8, window_bounds = array<i64: 96, 1>}, {pipeline_mode = #tpu.pipeline_mode<synchronous>, transform_indices = @transform_9, window_bounds = array<i64: 8, 96>}, {pipeline_mode = #tpu.pipeline_mode<synchronous>, transform_indices = @transform_10, window_bounds = array<i64: 8, 1>}, {transform_indices = @transform_11, window_bounds = array<i64: 8, 128>}]} {
    %c0 = arith.constant 0 : index
    %c0_0 = arith.constant 0 : index
    %0 = vector.load %arg1[%c0, %c0_0] : memref<128x32xf32, #tpu.memory_space<vmem>>, vector<128x32xf32>
    %1 = tpu.transpose %0, [1, 0] : vector<128x32xf32> -> vector<32x128xf32>
    %c0_1 = arith.constant 0 : index
    %c0_2 = arith.constant 0 : index
    %2 = vector.load %arg2[%c0_1, %c0_2] : memref<128x32xbf16, #tpu.memory_space<vmem>>, vector<128x32xbf16>
    %3 = arith.truncf %1 : vector<32x128xf32> to vector<32x128xbf16>
    %cst = arith.constant dense<0.000000e+00> : vector<128x128xf32>
    %4 = tpu.matmul %2, %3, %cst {dimension_numbers = #tpu.dot_dimension_numbers<[1], [0], [0], [1], [0, 0, 1, 1], [], []>} : vector<128x32xbf16>, vector<32x128xbf16>, vector<128x128xf32> -> vector<128x128xf32>
    %c0_3 = arith.constant 0 : index
    %c0_4 = arith.constant 0 : index
    %5 = vector.load %arg3[%c0_3, %c0_4] : memref<128x1xf32, #tpu.memory_space<vmem>>, vector<128x1xf32>
    %6 = vector.broadcast %5 : vector<128x1xf32> to vector<128x128xf32>
    %7 = arith.addf %4, %6 : vector<128x128xf32>
    %cst_5 = arith.constant 0.000000e+00 : f32
    %8 = vector.broadcast %cst_5 : f32 to vector<128x128xf32>
    %9 = arith.maximumf %7, %8 : vector<128x128xf32>
    %c0_6 = arith.constant 0 : index
    %c0_7 = arith.constant 0 : index
    %10 = vector.load %arg4[%c0_6, %c0_7] : memref<128x128xbf16, #tpu.memory_space<vmem>>, vector<128x128xbf16>
    %11 = arith.truncf %9 : vector<128x128xf32> to vector<128x128xbf16>
    %cst_8 = arith.constant dense<0.000000e+00> : vector<128x128xf32>
    %12 = tpu.matmul %10, %11, %cst_8 {dimension_numbers = #tpu.dot_dimension_numbers<[1], [0], [0], [1], [0, 0, 1, 1], [], []>} : vector<128x128xbf16>, vector<128x128xbf16>, vector<128x128xf32> -> vector<128x128xf32>
    %c0_9 = arith.constant 0 : index
    %c0_10 = arith.constant 0 : index
    %13 = vector.load %arg5[%c0_9, %c0_10] : memref<128x1xf32, #tpu.memory_space<vmem>>, vector<128x1xf32>
    %14 = vector.broadcast %13 : vector<128x1xf32> to vector<128x128xf32>
    %15 = arith.addf %12, %14 : vector<128x128xf32>
    %cst_11 = arith.constant 0.000000e+00 : f32
    %16 = vector.broadcast %cst_11 : f32 to vector<128x128xf32>
    %17 = arith.maximumf %15, %16 : vector<128x128xf32>
    %c0_12 = arith.constant 0 : index
    %c0_13 = arith.constant 0 : index
    %18 = vector.load %arg6[%c0_12, %c0_13] : memref<32x128xbf16, #tpu.memory_space<vmem>>, vector<32x128xbf16>
    %19 = arith.truncf %17 : vector<128x128xf32> to vector<128x128xbf16>
    %cst_14 = arith.constant dense<0.000000e+00> : vector<32x128xf32>
    %20 = tpu.matmul %18, %19, %cst_14 {dimension_numbers = #tpu.dot_dimension_numbers<[1], [0], [0], [1], [0, 0, 1, 1], [], []>} : vector<32x128xbf16>, vector<128x128xbf16>, vector<32x128xf32> -> vector<32x128xf32>
    %c0_15 = arith.constant 0 : index
    %c0_16 = arith.constant 0 : index
    %21 = vector.load %arg7[%c0_15, %c0_16] : memref<32x1xf32, #tpu.memory_space<vmem>>, vector<32x1xf32>
    %22 = vector.broadcast %21 : vector<32x1xf32> to vector<32x128xf32>
    %23 = arith.addf %20, %22 : vector<32x128xf32>
    %cst_17 = arith.constant 0.000000e+00 : f32
    %24 = vector.broadcast %cst_17 : f32 to vector<32x128xf32>
    %25 = arith.maximumf %23, %24 : vector<32x128xf32>
    %c0_18 = arith.constant 0 : index
    %c0_19 = arith.constant 0 : index
    %26 = vector.load %arg8[%c0_18, %c0_19] : memref<96x32xbf16, #tpu.memory_space<vmem>>, vector<96x32xbf16>
    %27 = arith.truncf %25 : vector<32x128xf32> to vector<32x128xbf16>
    %cst_20 = arith.constant dense<0.000000e+00> : vector<96x128xf32>
    %28 = tpu.matmul %26, %27, %cst_20 {dimension_numbers = #tpu.dot_dimension_numbers<[1], [0], [0], [1], [0, 0, 1, 1], [], []>} : vector<96x32xbf16>, vector<32x128xbf16>, vector<96x128xf32> -> vector<96x128xf32>
    %c0_21 = arith.constant 0 : index
    %c0_22 = arith.constant 0 : index
    %29 = vector.load %arg9[%c0_21, %c0_22] : memref<96x1xf32, #tpu.memory_space<vmem>>, vector<96x1xf32>
    %30 = vector.broadcast %29 : vector<96x1xf32> to vector<96x128xf32>
    %31 = arith.addf %28, %30 : vector<96x128xf32>
    %cst_23 = arith.constant 0.000000e+00 : f32
    %32 = vector.broadcast %cst_23 : f32 to vector<96x128xf32>
    %33 = arith.maximumf %31, %32 : vector<96x128xf32>
    %c0_24 = arith.constant 0 : index
    %c0_25 = arith.constant 0 : index
    %34 = vector.load %arg10[%c0_24, %c0_25] : memref<8x96xf32, #tpu.memory_space<vmem>>, vector<8x96xf32>
    %cst_26 = arith.constant dense<0.000000e+00> : vector<8x128xf32>
    %35 = tpu.matmul %34, %33, %cst_26 {dimension_numbers = #tpu.dot_dimension_numbers<[1], [0], [0], [1], [0, 0, 1, 1], [], []>} : vector<8x96xf32>, vector<96x128xf32>, vector<8x128xf32> -> vector<8x128xf32>
    %c0_27 = arith.constant 0 : index
    %c0_28 = arith.constant 0 : index
    %36 = vector.load %arg11[%c0_27, %c0_28] : memref<8x1xf32, #tpu.memory_space<vmem>>, vector<8x1xf32>
    %37 = vector.broadcast %36 : vector<8x1xf32> to vector<8x128xf32>
    %38 = arith.addf %35, %37 : vector<8x128xf32>
    %39 = tpu.iota {dimensions = array<i32: 0>} : vector<8x128xi32>
    %c6_i32 = arith.constant 6 : i32
    %40 = vector.broadcast %c6_i32 : i32 to vector<8x128xi32>
    %41 = arith.cmpi slt, %39, %40 : vector<8x128xi32>
    %cst_29 = arith.constant -1.000000e+30 : f32
    %42 = vector.broadcast %cst_29 : f32 to vector<8x128xf32>
    %43 = arith.select %41, %38, %42 : vector<8x128xi1>, vector<8x128xf32>
    %cst_30 = arith.constant dense<0xFF800000> : vector<128xf32>
    %44 = vector.multi_reduction <maximumf>, %43, %cst_30 [0] : vector<8x128xf32> to vector<128xf32>
    %45 = vector.shape_cast %44 : vector<128xf32> to vector<1x128xf32>
    %46 = vector.broadcast %45 : vector<1x128xf32> to vector<8x128xf32>
    %47 = arith.subf %43, %46 : vector<8x128xf32>
    %48 = math.exp %47 : vector<8x128xf32>
    %cst_31 = arith.constant dense<0.000000e+00> : vector<128xf32>
    %49 = vector.multi_reduction <add>, %48, %cst_31 [0] : vector<8x128xf32> to vector<128xf32>
    %50 = vector.shape_cast %49 : vector<128xf32> to vector<1x128xf32>
    %51 = vector.broadcast %50 : vector<1x128xf32> to vector<8x128xf32>
    %52 = arith.divf %48, %51 : vector<8x128xf32>
    %53 = arith.negf %38 : vector<8x128xf32>
    %54 = math.exp %53 : vector<8x128xf32>
    %cst_32 = arith.constant 1.000000e+00 : f32
    %55 = vector.broadcast %cst_32 : f32 to vector<8x128xf32>
    %56 = arith.addf %55, %54 : vector<8x128xf32>
    %57 = arith.divf %55, %56 : vector<8x128xf32>
    %c6_i32_33 = arith.constant 6 : i32
    %58 = vector.broadcast %c6_i32_33 : i32 to vector<8x128xi32>
    %59 = arith.cmpi eq, %39, %58 : vector<8x128xi32>
    %60 = arith.select %59, %57, %38 : vector<8x128xi1>, vector<8x128xf32>
    %61 = arith.select %41, %52, %60 : vector<8x128xi1>, vector<8x128xf32>
    %c0_34 = arith.constant 0 : index
    %c0_35 = arith.constant 0 : index
    %62 = vector.load %arg12[%c0_34, %c0_35] : memref<8x128xf32, #tpu.memory_space<vmem>>, vector<8x128xf32>
    tpu.vector_store %arg12[%c0_34, %c0_35], %61 {strides = array<i32>} : memref<8x128xf32, #tpu.memory_space<vmem>>, vector<8x128xf32>,
    return
  }
  func.func @transform_0(%arg0: i32) -> (i32, i32) {
    %c0_i32 = arith.constant 0 : i32
    %c0_i32_0 = arith.constant 0 : i32
    return %arg0, %c0_i32 : i32, i32
  }
  func.func @transform_1(%arg0: i32) -> (i32, i32) {
    %c0_i32 = arith.constant 0 : i32
    %c0_i32_0 = arith.constant 0 : i32
    %c0_i32_1 = arith.constant 0 : i32
    return %c0_i32, %c0_i32_0 : i32, i32
  }
  func.func @transform_2(%arg0: i32) -> (i32, i32) {
    %c0_i32 = arith.constant 0 : i32
    %c0_i32_0 = arith.constant 0 : i32
    %c0_i32_1 = arith.constant 0 : i32
    return %c0_i32, %c0_i32_0 : i32, i32
  }
  func.func @transform_3(%arg0: i32) -> (i32, i32) {
    %c0_i32 = arith.constant 0 : i32
    %c0_i32_0 = arith.constant 0 : i32
    %c0_i32_1 = arith.constant 0 : i32
    return %c0_i32, %c0_i32_0 : i32, i32
  }
  func.func @transform_4(%arg0: i32) -> (i32, i32) {
    %c0_i32 = arith.constant 0 : i32
    %c0_i32_0 = arith.constant 0 : i32
    %c0_i32_1 = arith.constant 0 : i32
    return %c0_i32, %c0_i32_0 : i32, i32
  }
  func.func @transform_5(%arg0: i32) -> (i32, i32) {
    %c0_i32 = arith.constant 0 : i32
    %c0_i32_0 = arith.constant 0 : i32
    %c0_i32_1 = arith.constant 0 : i32
    return %c0_i32, %c0_i32_0 : i32, i32
  }
  func.func @transform_6(%arg0: i32) -> (i32, i32) {
    %c0_i32 = arith.constant 0 : i32
    %c0_i32_0 = arith.constant 0 : i32
    %c0_i32_1 = arith.constant 0 : i32
    return %c0_i32, %c0_i32_0 : i32, i32
  }
  func.func @transform_7(%arg0: i32) -> (i32, i32) {
    %c0_i32 = arith.constant 0 : i32
    %c0_i32_0 = arith.constant 0 : i32
    %c0_i32_1 = arith.constant 0 : i32
    return %c0_i32, %c0_i32_0 : i32, i32
  }
  func.func @transform_8(%arg0: i32) -> (i32, i32) {
    %c0_i32 = arith.constant 0 : i32
    %c0_i32_0 = arith.constant 0 : i32
    %c0_i32_1 = arith.constant 0 : i32
    return %c0_i32, %c0_i32_0 : i32, i32
  }
  func.func @transform_9(%arg0: i32) -> (i32, i32) {
    %c0_i32 = arith.constant 0 : i32
    %c0_i32_0 = arith.constant 0 : i32
    %c0_i32_1 = arith.constant 0 : i32
    return %c0_i32, %c0_i32_0 : i32, i32
  }
  func.func @transform_10(%arg0: i32) -> (i32, i32) {
    %c0_i32 = arith.constant 0 : i32
    %c0_i32_0 = arith.constant 0 : i32
    %c0_i32_1 = arith.constant 0 : i32
    return %c0_i32, %c0_i32_0 : i32, i32
  }
  func.func @transform_11(%arg0: i32) -> (i32, i32) {
    %c0_i32 = arith.constant 0 : i32
    %c0_i32_0 = arith.constant 0 : i32
    return %c0_i32, %arg0 : i32, i32
  }
}

</mosaic_0001>

<bundles_post_ra>
// kernel: tpu_custom_call.1
= control target key start
LH: loop header
LB: loop body
LE: loop exit
PB: predicated region body
PF: predicated region fallthrough
CT: control target
= control target key end

     0   :  { %s1490_s0 = inlined_call_operand.vmem [shape: f32[128,32], index: 0, kind: input, shape index: {}]   ;;  %s1491_s1 = inlined_call_operand.vmem [shape: bf16[128,32], index: 1, kind: input, shape index: {}]   ;;  %s1492_s2 = inlined_call_operand.vmem [shape: f32[128,1], index: 2, kind: input, shape index: {}]   ;;  %s1493_s3 = inlined_call_operand.vmem [shape: bf16[128,128], index: 3, kind: input, shape index: {}]   ;;  %s1494_s4 = inlined_call_operand.vmem [shape: f32[128,1], index: 4, kind: input, shape index: {}]   ;;  %s1495_s5 = inlined_call_operand.vmem [shape: bf16[32,128], index: 5, kind: input, shape index: {}]   ;;  %s1496_s6 = inlined_call_operand.vmem [shape: f32[32,1], index: 6, kind: input, shape index: {}]   ;;  %s1497_s7 = inlined_call_operand.vmem [shape: bf16[96,32], index: 7, kind: input, shape index: {}]   ;;  %s1498_s8 = inlined_call_operand.vmem [shape: f32[96,1], index: 8, kind: input, shape index: {}]   ;;  %s1499_s9 = inlined_call_operand.vmem [shape: f32[8,96], index: 9, kind: input, shape index: {}]   ;;  %s1500_s10 = inlined_call_operand.vmem [shape: f32[8,1], index: 10, kind: input, shape index: {}]   ;;  %s1501_s11 = inlined_call_operand.hbm [shape: f32[8,128], index: 11, kind: output, shape index: {}]  }
   0x1   :  { %v40_v0 = vld [vmem:[%s1490_s0] sm:$0xff] }
   0x2   :  { %56 = vxpose.xlu0.b32.start [1/16] (narrow) %v40_v0, 32 }
   0x3   :  { %16 = vsyncpa [#allocation3], 0  ;;  %v41_v1 = vld [vmem:[%s1490_s0 + $0x8] sm:$0xff]  ;;  %v42_v2 = vld [vmem:[%s1490_s0 + $0x10] sm:$0xff]  ;;  %v1108_v12 = vmov 0   ;;  %vm242_vm0 = vcmask 261120  }
   0x4   :  { %v43_v3 = vld [vmem:[%s1490_s0 + $0x18] sm:$0xff]  ;;  %v44_v4 = vld [vmem:[%s1490_s0 + $0x20] sm:$0xff]  ;;  %v45_v5 = vld [vmem:[%s1490_s0 + $0x28] sm:$0xff]  ;;  %1071 = vset.pattern.permute.xlu1 %v1108_v12  ;;  %1072 = vset.pattern.permute.xlu2 %v1108_v12  ;;  %vm828_vm1 = vcmask 785408   ;;  %s916_s24 = sshll.u32 %s1501_s11, 4  ;;  %s917_s24 = int_to_ptr.hbm [resolvable:$true] %s916_s24 }
   0x5   :  { %v46_v6 = vld [vmem:[%s1490_s0 + $0x30] sm:$0xff]  ;;  %v47_v7 = vld [vmem:[%s1490_s0 + $0x38] sm:$0xff]  ;;  %v48_v8 = vld [vmem:[%s1490_s0 + $0x40] sm:$0xff] }
   0x6   :  { %v49_v9 = vld [vmem:[%s1490_s0 + $0x48] sm:$0xff]  ;;  %v50_v10 = vld [vmem:[%s1490_s0 + $0x50] sm:$0xff]  ;;  %v51_v13 = vld [vmem:[%s1490_s0 + $0x58] sm:$0xff] }
   0x7   :  { %v120_v11 = vld [vmem:[%s1492_s2 + $0x70] sm:$0xff]  ;;  %v121_v14 = vld [vmem:[%s1492_s2 + $0x78] sm:$0xff]  ;;  %v118_v15 = vld [vmem:[%s1492_s2 + $0x60] sm:$0xff] }
   0x8   :  { %194 = vperm.xlu1 %1071, %v120_v11   ;;  %184 = vperm.xlu2 %1072, %v118_v15   ;;  %v52_v16 = vld [vmem:[%s1490_s0 + $0x60] sm:$0xff]  ;;  %v119_v17 = vld [vmem:[%s1492_s2 + $0x68] sm:$0xff]  ;;  %v116_v18 = vld [vmem:[%s1492_s2 + $0x50] sm:$0xff] }
   0x9   :  { %v53_v19 = vld [vmem:[%s1490_s0 + $0x68] sm:$0xff]  ;;  %v117_v20 = vld [vmem:[%s1492_s2 + $0x58] sm:$0xff]  ;;  %v114_v21 = vld [vmem:[%s1492_s2 + $0x40] sm:$0xff] }
   0xa   :  { %57 = vxpose.xlu0.b32.cont [2/16] (narrow) %v41_v1, 32  ;;  %v54_v22 = vld [vmem:[%s1490_s0 + $0x70] sm:$0xff]  ;;  %v55_v24 = vld [vmem:[%s1490_s0 + $0x78] sm:$0xff]  ;;  %v110_v25 = vld [vmem:[%s1492_s2 + $0x20] sm:$0xff] }
   0xb   :  { %v112_v23 = vld [vmem:[%s1492_s2 + $0x30] sm:$0xff]  ;;  %v115_v26 = vld [vmem:[%s1492_s2 + $0x48] sm:$0xff]  ;;  %v113_v28 = vld [vmem:[%s1492_s2 + $0x38] sm:$0xff] }
   0xc   :  { %v108_v27 = vld [vmem:[%s1492_s2 + $0x10] sm:$0xff]  ;;  %v106_v29 = vld [vmem:[%s1492_s2] sm:$0xff]  ;;  %v111_v30 = vld [vmem:[%s1492_s2 + $0x28] sm:$0xff] }
   0xd   :  { %v370_v31 = vld [vmem:[%s1494_s4 + $0x70] sm:$0xff]  ;;  %v109_v32 = vld [vmem:[%s1492_s2 + $0x18] sm:$0xff]  ;;  %v368_v33 = vld [vmem:[%s1494_s4 + $0x60] sm:$0xff] }
   0xe   :  { %v107_v34 = vld [vmem:[%s1492_s2 + $0x8] sm:$0xff]  ;;  %v366_v35 = vld [vmem:[%s1494_s4 + $0x50] sm:$0xff]  ;;  %v371_v37 = vld [vmem:[%s1494_s4 + $0x78] sm:$0xff] }
   0xf   :  { %v364_v38 = vld [vmem:[%s1494_s4 + $0x40] sm:$0xff]  ;;  %v369_v40 = vld [vmem:[%s1494_s4 + $0x68] sm:$0xff]  ;;  %v362_v41 = vld [vmem:[%s1494_s4 + $0x30] sm:$0xff] }
  0x10   :  { %199 = vperm.xlu1 %1071, %v121_v14   ;;  %189 = vperm.xlu2 %1072, %v119_v17   ;;  %v367_v43 = vld [vmem:[%s1494_s4 + $0x58] sm:$0xff]  ;;  %v360_v44 = vld [vmem:[%s1494_s4 + $0x20] sm:$0xff]  ;;  %v365_v49 = vld [vmem:[%s1494_s4 + $0x48] sm:$0xff] }
  0x11   :  { %v1037_v48 = vld [vmem:[%s1491_s1] sm:$0xff]  ;;  %v358_v50 = vld [vmem:[%s1494_s4 + $0x10] sm:$0xff]  ;;  %v363_v51 = vld [vmem:[%s1494_s4 + $0x38] sm:$0xff] }
  0x12   :  { %58 = vxpose.xlu0.b32.cont [3/16] (narrow) %v42_v2, 32  ;;  %v356_v52 = vld [vmem:[%s1494_s4] sm:$0xff]  ;;  %v1038_v53 = vld [vmem:[%s1491_s1 + $0x8] sm:$0xff]  ;;  %v580_v55 = vld [vmem:[%s1496_s6 + $0x18] sm:$0xff] }
  0x13   :  { %v361_v54 = vld [vmem:[%s1494_s4 + $0x28] sm:$0xff]  ;;  %v359_v56 = vld [vmem:[%s1494_s4 + $0x18] sm:$0xff]  ;;  %v1039_v58 = vld [vmem:[%s1491_s1 + $0x10] sm:$0xff] }
  0x14   :  { %v578_v57 = vld [vmem:[%s1496_s6 + $0x8] sm:$0xff]  ;;  %v660_v60 = vld [vmem:[%s1498_s8 + $0x50] sm:$0xff]  ;;  %v577_v61 = vld [vmem:[%s1496_s6] sm:$0xff] }
  0x15   :  { %v357_v59 = vld [vmem:[%s1494_s4 + $0x8] sm:$0xff]  ;;  %v658_v62 = vld [vmem:[%s1498_s8 + $0x40] sm:$0xff]  ;;  %v1040_v63 = vld [vmem:[%s1491_s1 + $0x18] sm:$0xff] }
  0x16   :  { %v661_v0 = vld [vmem:[%s1498_s8 + $0x58] sm:$0xff]  ;;  %v656_v1 = vld [vmem:[%s1498_s8 + $0x30] sm:$0xff]  ;;  %v659_v2 = vld [vmem:[%s1498_s8 + $0x48] sm:$0xff] }
  0x17   :  { %v653_v14 = vld [vmem:[%s1498_s8 + $0x18] sm:$0xff]  ;;  %v651_v17 = vld [vmem:[%s1498_s8 + $0x8] sm:$0xff] }
  0x18   :  { %174 = vperm.xlu1 %1071, %v116_v18   ;;  %179 = vperm.xlu2 %1072, %v117_v20  }
  0x1a   :  { %59 = vxpose.xlu0.b32.cont [4/16] (narrow) %v43_v3, 32  ;;  %v654_v3 = vld [vmem:[%s1498_s8 + $0x20] sm:$0xff] }
  0x20   :  { %164 = vperm.xlu1 %1071, %v114_v21   ;;  %169 = vperm.xlu2 %1072, %v115_v26   ;;  %v822_v21 = vld [vmem:[%s1500_s10] sm:$0xff] }
  0x22   :  { %60 = vxpose.xlu0.b32.cont [5/16] (narrow) %v44_v4, 32  ;;  %v1041_v4 = vld [vmem:[%s1491_s1 + $0x20] sm:$0xff] }
  0x28   :  { %154 = vperm.xlu1 %1071, %v112_v23   ;;  %159 = vperm.xlu2 %1072, %v113_v28  }
  0x2a   :  { %61 = vxpose.xlu0.b32.cont [6/16] (narrow) %v45_v5, 32  ;;  %v657_v5 = vld [vmem:[%s1498_s8 + $0x38] sm:$0xff] }
  0x30   :  { %144 = vperm.xlu1 %1071, %v110_v25   ;;  %149 = vperm.xlu2 %1072, %v111_v30  }
  0x32   :  { %62 = vxpose.xlu0.b32.cont [7/16] (narrow) %v46_v6, 32  ;;  %v652_v6 = vld [vmem:[%s1498_s8 + $0x10] sm:$0xff] }
  0x38   :  { %134 = vperm.xlu1 %1071, %v108_v27   ;;  %139 = vperm.xlu2 %1072, %v109_v32  }
  0x3a   :  { %63 = vxpose.xlu0.b32.cont [8/16] (narrow) %v47_v7, 32 }
  0x40   :  { %124 = vperm.xlu1 %1071, %v106_v29   ;;  %129 = vperm.xlu2 %1072, %v107_v34  }
  0x42   :  { %64 = vxpose.xlu0.b32.cont [9/16] (narrow) %v48_v8, 32 }
  0x48   :  { %444 = vperm.xlu1 %1071, %v370_v31   ;;  %449 = vperm.xlu2 %1072, %v371_v37  }
  0x4a   :  { %65 = vxpose.xlu0.b32.cont [10/16] (narrow) %v49_v9, 32  ;;  %v655_v9 = vld [vmem:[%s1498_s8 + $0x28] sm:$0xff] }
  0x50   :  { %434 = vperm.xlu1 %1071, %v368_v33   ;;  %439 = vperm.xlu2 %1072, %v369_v40  }
  0x52   :  { %66 = vxpose.xlu0.b32.cont [11/16] (narrow) %v50_v10, 32  ;;  %v650_v10 = vld [vmem:[%s1498_s8] sm:$0xff] }
  0x58   :  { %424 = vperm.xlu1 %1071, %v366_v35   ;;  %429 = vperm.xlu2 %1072, %v367_v43  }
  0x5a   :  { %67 = vxpose.xlu0.b32.cont [12/16] (narrow) %v51_v13, 32  ;;  %v1042_v13 = vld [vmem:[%s1491_s1 + $0x28] sm:$0xff] }
  0x60   :  { %414 = vperm.xlu1 %1071, %v364_v38   ;;  %419 = vperm.xlu2 %1072, %v365_v49  }
  0x62   :  { %68 = vxpose.xlu0.b32.cont [13/16] (narrow) %v52_v16, 32  ;;  %v1371_v8 = vpop.permute.xlu2 %184 }
  0x68   :  { %404 = vperm.xlu1 %1071, %v362_v41   ;;  %409 = vperm.xlu2 %1072, %v363_v51  }
  0x6a   :  { %69 = vxpose.xlu0.b32.cont [14/16] (narrow) %v53_v19, 32  ;;  %v1043_v19 = vld [vmem:[%s1491_s1 + $0x30] sm:$0xff] }
  0x70   :  { %394 = vperm.xlu1 %1071, %v360_v44   ;;  %399 = vperm.xlu2 %1072, %v361_v54  }
  0x72   :  { %70 = vxpose.xlu0.b32.cont [15/16] (narrow) %v54_v22, 32 }
  0x78   :  { %384 = vperm.xlu1 %1071, %v358_v50   ;;  %389 = vperm.xlu2 %1072, %v359_v56  }
  0x7a   :  { %71 = vxpose.xlu0.b32.end [16/16] (narrow) %v55_v24, 32  ;;  %v1369_v7 = vpop.permute.xlu1 %194  ;;  %v1044_v24 = vld [vmem:[%s1491_s1 + $0x38] sm:$0xff] }
  0x80   :  { %374 = vperm.xlu1 %1071, %v356_v52   ;;  %379 = vperm.xlu2 %1072, %v357_v59  }
  0x82   :  { %v1380_v11 = vpop.permute.xlu1 %199 }
  0x88   :  { %598 = vperm.xlu1 %1071, %v580_v55   ;;  %583 = vperm.xlu2 %1072, %v577_v61  }
  0x8a   :  { %v1389_v15 = vpop.permute.xlu1 %174 }
  0x90   :  { %588 = vperm.xlu1 %1071, %v578_v57   ;;  %719 = vperm.xlu2 %1072, %v661_v0  }
  0x92   :  { %v1394_v18 = vpop.permute.xlu1 %164 }
  0x98   :  { %714 = vperm.xlu1 %1071, %v660_v60   ;;  %709 = vperm.xlu2 %1072, %v659_v2  }
  0x9a   :  { %v155_v22 = vpop.permute.xlu1 %154 }
  0xa0   :  { %704 = vperm.xlu1 %1071, %v658_v62   ;;  %699 = vperm.xlu2 %1072, %v657_v5  }
  0xa2   :  { %v145_v25 = vpop.permute.xlu1 %144 }
  0xa6   :  { %v72_v36 = vpop.trf.xlu0 }
  0xa8   :  { %694 = vperm.xlu1 %1071, %v656_v1   ;;  %689 = vperm.xlu2 %1072, %v655_v9  }
  0xaa   :  { %v135_v27 = vpop.permute.xlu1 %134 }
  0xae   :  { %v73_v39 = vpop.trf.xlu0 }
  0xaf   :  { %v104_v47 = vpack.c.bf16 %v73_v39, %v72_v36 }
  0xb0   :  { %684 = vperm.xlu1 %1071, %v654_v3   ;;  %679 = vperm.xlu2 %1072, %v653_v14  }
  0xb2   :  { %v125_v30 = vpop.permute.xlu1 %124 }
  0xb6   :  { %v74_v42 = vpop.trf.xlu0 }
  0xb8   :  { %674 = vperm.xlu1 %1071, %v652_v6   ;;  %669 = vperm.xlu2 %1072, %v651_v17  }
  0xbe   :  { %v75_v45 = vpop.trf.xlu0 }
  0xbf   :  { %v105_v46 = vpack.c.bf16 %v75_v45, %v74_v42 }
  0xc0   :  { %664 = vperm.xlu1 %1071, %v650_v10   ;;  %825 = vperm.xlu2 %1072, %v822_v21  }
  0xc1   :  { %273 = vmatpush.bf16.msra.mxu0 %v105_v46 }
  0xc5   :  { %274 = vmatpush.bf16.msra.mxu0 %v104_v47 }
  0xc8   :  { %957 = vmatmul.msk.bf16.vlgmr.msra.gmra.mxu0 %vm242_vm0, %v1037_v48 }
  0xd8   :  { %958 = vmatmul.msk.bf16.gmra.mxu0 %vm242_vm0, %v1038_v53 }
  0xe1   :  { %1073 = vset.pattern.permute.xlu0 %v1108_v12  ;;  %v190_v12 = vpop.permute.xlu2 %189 }
  0xe8   :  { %959 = vmatmul.msk.bf16.gmra.mxu0 %vm242_vm0, %v1039_v58 }
  0xe9   :  { %v180_v16 = vpop.permute.xlu2 %179 }
  0xf1   :  { %v1399_v20 = vpop.permute.xlu2 %169 }
  0xf8   :  { %960 = vmatmul.msk.bf16.gmra.mxu0 %vm242_vm0, %v1040_v63 }
  0xf9   :  { %v160_v23 = vpop.permute.xlu2 %159 }
 0x101   :  { %v150_v26 = vpop.permute.xlu2 %149 }
 0x108   :  { %961 = vmatmul.msk.bf16.gmra.mxu0 %vm242_vm0, %v1041_v4 }
 0x109   :  { %v140_v28 = vpop.permute.xlu2 %139 }
 0x111   :  { %v130_v32 = vpop.permute.xlu2 %129 }
 0x118   :  { %962 = vmatmul.msk.bf16.gmra.mxu0 %vm242_vm0, %v1042_v13 }
 0x128   :  { %963 = vmatmul.msk.bf16.gmra.mxu0 %vm242_vm0, %v1043_v19 }
 0x138   :  { %964 = vmatmul.msk.bf16.gmra.mxu0 %vm242_vm0, %v1044_v24 }
 0x145   :  { %v276_v29 = vpop.f32.mrf.mxu0 }
 0x146   :  { %v277_v31 = vadd.f32 %v276_v29, %v125_v30  ;;  %v1049_v29 = vld [vmem:[%s1493_s3 + $0x20] sm:$0xff]  ;;  %v445_v30 = vpop.permute.xlu1 %444 }
 0x148   :  { %v316_v35 = vmax.f32 %v277_v31, 0.0  ;;  %v450_v31 = vpop.permute.xlu2 %449 }
 0x14d   :  { %v278_v33 = vpop.f32.mrf.mxu0 }
 0x14e   :  { %v279_v34 = vadd.f32 %v278_v33, %v130_v32  ;;  %v435_v32 = vpop.permute.xlu1 %434 }
 0x150   :  { %v317_v36 = vmax.f32 %v279_v34, 0.0  ;;  %v440_v33 = vpop.permute.xlu2 %439  ;;  %v1050_v34 = vld [vmem:[%s1493_s3 + $0x28] sm:$0xff] }
 0x152   :  { %v1409_v37 = vpack.c.bf16 %v317_v36, %v316_v35 }
 0x155   :  { %v281_v38 = vpop.f32.mrf.mxu0 }
 0x156   :  { %v282_v39 = vadd.f32 %v281_v38, %v135_v27  ;;  %v1047_v27 = vld [vmem:[%s1493_s3 + $0x10] sm:$0xff]  ;;  %v425_v35 = vpop.permute.xlu1 %424 }
 0x158   :  { %v318_v42 = vmax.f32 %v282_v39, 0.0  ;;  %v430_v36 = vpop.permute.xlu2 %429 }
 0x15d   :  { %v283_v40 = vpop.f32.mrf.mxu0 }
 0x15e   :  { %v284_v41 = vadd.f32 %v283_v40, %v140_v28  ;;  %v1048_v28 = vld [vmem:[%s1493_s3 + $0x18] sm:$0xff] }
 0x160   :  { %v319_v43 = vmax.f32 %v284_v41, 0.0  ;;  %v420_v38 = vpop.permute.xlu2 %419 }
 0x162   :  { %v349_v44 = vpack.c.bf16 %v319_v43, %v318_v42 }
 0x165   :  { %v286_v45 = vpop.f32.mrf.mxu0 }
 0x166   :  { %v287_v46 = vadd.f32 %v286_v45, %v145_v25 }
 0x168   :  { %v320_v49 = vmax.f32 %v287_v46, 0.0  ;;  %v410_v40 = vpop.permute.xlu2 %409 }
 0x16d   :  { %v288_v47 = vpop.f32.mrf.mxu0 }
 0x16e   :  { %v289_v48 = vadd.f32 %v288_v47, %v150_v26  ;;  %v1052_v26 = vld [vmem:[%s1493_s3 + $0x38] sm:$0xff] }
 0x170   :  { %v321_v50 = vmax.f32 %v289_v48, 0.0  ;;  %v400_v42 = vpop.permute.xlu2 %399 }
 0x172   :  { %v350_v51 = vpack.c.bf16 %v321_v50, %v320_v49 }
 0x175   :  { %v291_v52 = vpop.f32.mrf.mxu0 }
 0x176   :  { %v292_v53 = vadd.f32 %v291_v52, %v155_v22 }
 0x178   :  { %v322_v56 = vmax.f32 %v292_v53, 0.0 }
 0x17d   :  { %v293_v54 = vpop.f32.mrf.mxu0 }
 0x17e   :  { %v294_v55 = vadd.f32 %v293_v54, %v160_v23 }
 0x180   :  { %v323_v57 = vmax.f32 %v294_v55, 0.0 }
 0x182   :  { %v351_v58 = vpack.c.bf16 %v323_v57, %v322_v56 }
 0x185   :  { %v296_v59 = vpop.f32.mrf.mxu0 }
 0x18d   :  { %v298_v60 = vpop.f32.mrf.mxu0 }
 0x18e   :  { %v299_v22 = vadd.f32 %v298_v60, %v1399_v20  ;;  %v1046_v20 = vld [vmem:[%s1493_s3 + $0x8] sm:$0xff] }
 0x195   :  { %v301_v61 = vpop.f32.mrf.mxu0 }
 0x196   :  { %v302_v19 = vadd.f32 %v301_v61, %v1389_v15  ;;  %v1045_v15 = vld [vmem:[%s1493_s3] sm:$0xff] }
 0x198   :  { %v326_v24 = vmax.f32 %v302_v19, 0.0 }
 0x19d   :  { %v303_v62 = vpop.f32.mrf.mxu0 }
 0x19e   :  { %v304_v13 = vadd.f32 %v303_v62, %v180_v16 }
 0x1a0   :  { %v327_v23 = vmax.f32 %v304_v13, 0.0 }
 0x1a5   :  { %v306_v63 = vpop.f32.mrf.mxu0 }
 0x1a6   :  { %v307_v6 = vadd.f32 %v306_v63, %v1371_v8  ;;  %v325_v8 = vmax.f32 %v299_v22, 0.0 }
 0x1a8   :  { %v328_v21 = vmax.f32 %v307_v6, 0.0 }
 0x1ad   :  { %v308_v0 = vpop.f32.mrf.mxu0 }
 0x1ae   :  { %v309_v4 = vadd.f32 %v308_v0, %v190_v12  ;;  %v297_v12 = vadd.f32 %v296_v59, %v1394_v18  ;;  %v1051_v18 = vld [vmem:[%s1493_s3 + $0x30] sm:$0xff] }
 0x1b0   :  { %v329_v14 = vmax.f32 %v309_v4, 0.0  ;;  %v324_v25 = vmax.f32 %v297_v12, 0.0 }
 0x1b2   :  { %v352_v16 = vpack.c.bf16 %v325_v8, %v324_v25 }
 0x1b5   :  { %v311_v1 = vpop.f32.mrf.mxu0 }
 0x1b6   :  { %v312_v2 = vadd.f32 %v311_v1, %v1369_v7  ;;  %v354_v7 = vpack.c.bf16 %v329_v14, %v328_v21 }
 0x1b8   :  { %v330_v9 = vmax.f32 %v312_v2, 0.0 }
 0x1bd   :  { %v313_v3 = vpop.f32.mrf.mxu0 }
 0x1be   :  { %v314_v5 = vadd.f32 %v313_v3, %v1380_v11  ;;  %v353_v11 = vpack.c.bf16 %v327_v23, %v326_v24 }
 0x1c0   :  { %v331_v10 = vmax.f32 %v314_v5, 0.0 }
 0x1c2   :  { %v355_v17 = vpack.c.bf16 %v331_v10, %v330_v9 }
 0x1c4   :  { %500 = vmatpush.bf16.msra.mxu1 %v355_v17  ;;  %1061 = vmatpush.bf16.msra.mxu2 %v355_v17 }
 0x1c8   :  { %501 = vmatpush.bf16.msra.mxu1 %v354_v7  ;;  %1062 = vmatpush.bf16.msra.mxu2 %v354_v7 }
 0x1cc   :  { %502 = vmatpush.bf16.msra.mxu1 %v353_v11  ;;  %1063 = vmatpush.bf16.msra.mxu2 %v353_v11 }
 0x1d0   :  { %503 = vmatpush.bf16.msra.mxu1 %v352_v16  ;;  %1064 = vmatpush.bf16.msra.mxu2 %v352_v16 }
 0x1d4   :  { %504 = vmatpush.bf16.msra.mxu1 %v351_v58  ;;  %1065 = vmatpush.bf16.msra.mxu2 %v351_v58 }
 0x1d8   :  { %505 = vmatpush.bf16.msra.mxu1 %v350_v51  ;;  %1066 = vmatpush.bf16.msra.mxu2 %v350_v51 }
 0x1dc   :  { %506 = vmatpush.bf16.msra.mxu1 %v349_v44  ;;  %1067 = vmatpush.bf16.msra.mxu2 %v349_v44  ;;  %v390_v44 = vpop.permute.xlu2 %389 }
 0x1e0   :  { %507 = vmatpush.bf16.msra.mxu1 %v1409_v37  ;;  %1068 = vmatpush.bf16.msra.mxu2 %v1409_v37  ;;  %v415_v37 = vpop.permute.xlu1 %414 }
 0x1e3   :  { %508 = vmatmul.bf16.vlgmr.msra.gmra.mxu1 %v1045_v15  ;;  %538 = vmatmul.bf16.vlgmr.msra.gmra.mxu2 %v1051_v18 }
 0x1e4   :  { %v380_v49 = vpop.permute.xlu2 %379 }
 0x1e8   :  { %v405_v39 = vpop.permute.xlu1 %404 }
 0x1f0   :  { %v395_v41 = vpop.permute.xlu1 %394 }
 0x1f3   :  { %513 = vmatmul.bf16.gmra.mxu1 %v1046_v20  ;;  %543 = vmatmul.bf16.gmra.mxu2 %v1052_v26 }
 0x1f8   :  { %v385_v43 = vpop.permute.xlu1 %384 }
 0x200   :  { %v375_v46 = vpop.permute.xlu1 %374 }
 0x203   :  { %518 = vmatmul.bf16.gmra.mxu1 %v1047_v27 }
 0x213   :  { %523 = vmatmul.bf16.gmra.mxu1 %v1048_v28 }
 0x223   :  { %528 = vmatmul.bf16.gmra.mxu1 %v1049_v29 }
 0x233   :  { %533 = vmatmul.bf16.gmra.mxu1 %v1050_v34 }
 0x260   :  { %v509_v45 = vpop.f32.mrf.mxu1 }
 0x261   :  { %v510_v48 = vadd.f32 %v509_v45, %v375_v46 }
 0x263   :  { %v549_v52 = vmax.f32 %v510_v48, 0.0 }
 0x266   :  { %v539_v47 = vpop.f32.mrf.mxu2 }
 0x267   :  { %v540_v5 = vadd.f32 %v539_v47, %v435_v32 }
 0x268   :  { %v511_v50 = vpop.f32.mrf.mxu1 }
 0x269   :  { %v512_v51 = vadd.f32 %v511_v50, %v380_v49  ;;  %v561_v14 = vmax.f32 %v540_v5, 0.0 }
 0x26b   :  { %v550_v53 = vmax.f32 %v512_v51, 0.0 }
 0x26d   :  { %v569_v54 = vpack.c.bf16 %v550_v53, %v549_v52  ;;  %v584_v52 = vpop.permute.xlu2 %583 }
 0x26e   :  { %v541_v55 = vpop.f32.mrf.mxu2 }
 0x26f   :  { %v542_v2 = vadd.f32 %v541_v55, %v440_v33 }
 0x270   :  { %v514_v56 = vpop.f32.mrf.mxu1 }
 0x271   :  { %v515_v58 = vadd.f32 %v514_v56, %v385_v43  ;;  %v562_v10 = vmax.f32 %v542_v2, 0.0 }
 0x273   :  { %v551_v61 = vmax.f32 %v515_v58, 0.0  ;;  %v575_v17 = vpack.c.bf16 %v562_v10, %v561_v14 }
 0x276   :  { %v544_v57 = vpop.f32.mrf.mxu2 }
 0x277   :  { %v545_v63 = vadd.f32 %v544_v57, %v445_v30 }
 0x278   :  { %v516_v59 = vpop.f32.mrf.mxu1 }
 0x279   :  { %v517_v60 = vadd.f32 %v516_v59, %v390_v44  ;;  %v563_v6 = vmax.f32 %v545_v63, 0.0  ;;  %v599_v44 = vpop.permute.xlu1 %598  ;;  %v1058_v63 = vld [vmem:[%s1497_s7 + $0x18] sm:$0xff] }
 0x27b   :  { %v552_v62 = vmax.f32 %v517_v60, 0.0  ;;  %v1055_v60 = vld [vmem:[%s1497_s7] sm:$0xff] }
 0x27d   :  { %v570_v0 = vpack.c.bf16 %v552_v62, %v551_v61  ;;  %v1056_v61 = vld [vmem:[%s1497_s7 + $0x8] sm:$0xff]  ;;  %v1057_v62 = vld [vmem:[%s1497_s7 + $0x10] sm:$0xff] }
 0x27e   :  { %v546_v1 = vpop.f32.mrf.mxu2 }
 0x27f   :  { %v547_v3 = vadd.f32 %v546_v1, %v450_v31  ;;  %v1060_v1 = vld [vmem:[%s1497_s7 + $0x28] sm:$0xff] }
 0x280   :  { %v519_v4 = vpop.f32.mrf.mxu1 }
 0x281   :  { %v564_v9 = vmax.f32 %v547_v3, 0.0  ;;  %v520_v33 = vadd.f32 %v519_v4, %v395_v41  ;;  %v589_v48 = vpop.permute.xlu1 %588 }
 0x283   :  { %v576_v13 = vpack.c.bf16 %v564_v9, %v563_v6 }
 0x285   :  { %613 = vmatpush.bf16.msrb.mxu2 %v576_v13  ;;  %v720_v13 = vpop.permute.xlu2 %719 }
 0x288   :  { %v521_v19 = vpop.f32.mrf.mxu1 }
 0x289   :  { %614 = vmatpush.bf16.msrb.mxu2 %v575_v17  ;;  %v522_v30 = vadd.f32 %v521_v19, %v400_v42  ;;  %v715_v17 = vpop.permute.xlu1 %714 }
 0x28b   :  { %v554_v43 = vmax.f32 %v522_v30, 0.0 }
 0x290   :  { %v524_v21 = vpop.f32.mrf.mxu1 }
 0x291   :  { %v525_v28 = vadd.f32 %v524_v21, %v405_v39  ;;  %v1053_v39 = vld [vmem:[%s1495_s5] sm:$0xff]  ;;  %v710_v21 = vpop.permute.xlu2 %709 }
 0x293   :  { %v555_v34 = vmax.f32 %v525_v28, 0.0 }
 0x298   :  { %v526_v22 = vpop.f32.mrf.mxu1 }
 0x299   :  { %v527_v20 = vadd.f32 %v526_v22, %v410_v40  ;;  %v1054_v40 = vld [vmem:[%s1495_s5 + $0x8] sm:$0xff]  ;;  %v705_v22 = vpop.permute.xlu1 %704 }
 0x29b   :  { %v556_v31 = vmax.f32 %v527_v20, 0.0 }
 0x2a0   :  { %v529_v23 = vpop.f32.mrf.mxu1 }
 0x2a1   :  { %v530_v16 = vadd.f32 %v529_v23, %v415_v37  ;;  %v553_v37 = vmax.f32 %v520_v33, 0.0 }
 0x2a3   :  { %v557_v29 = vmax.f32 %v530_v16, 0.0 }
 0x2a8   :  { %v531_v7 = vpop.f32.mrf.mxu1 }
 0x2a9   :  { %v532_v11 = vadd.f32 %v531_v7, %v420_v38  ;;  %v571_v38 = vpack.c.bf16 %v554_v43, %v553_v37  ;;  %v700_v7 = vpop.permute.xlu2 %699 }
 0x2ab   :  { %v558_v26 = vmax.f32 %v532_v11, 0.0 }
 0x2ad   :  { %v573_v32 = vpack.c.bf16 %v558_v26, %v557_v29 }
 0x2b0   :  { %v534_v12 = vpop.f32.mrf.mxu1 }
 0x2b1   :  { %v535_v24 = vadd.f32 %v534_v12, %v425_v35  ;;  %v572_v35 = vpack.c.bf16 %v556_v31, %v555_v34  ;;  %v695_v12 = vpop.permute.xlu1 %694 }
 0x2b3   :  { %v559_v15 = vmax.f32 %v535_v24, 0.0 }
 0x2b8   :  { %v536_v8 = vpop.f32.mrf.mxu1 }
 0x2b9   :  { %v537_v25 = vadd.f32 %v536_v8, %v430_v36  ;;  %v579_v36 = vld [vmem:[%s1496_s6 + $0x10] sm:$0xff]  ;;  %v690_v8 = vpop.permute.xlu2 %689  ;;  %v685_v11 = vpop.permute.xlu1 %684 }
 0x2ba   :  { %593 = vperm.xlu0 %1073, %v579_v36  }
 0x2bb   :  { %v560_v18 = vmax.f32 %v537_v25, 0.0 }
 0x2bd   :  { %v574_v27 = vpack.c.bf16 %v560_v18, %v559_v15 }
 0x2bf   :  { %615 = vmatpush.bf16.msrb.mxu2 %v574_v27 }
 0x2c1   :  { %v680_v30 = vpop.permute.xlu2 %679  ;;  %v675_v33 = vpop.permute.xlu1 %674 }
 0x2c3   :  { %616 = vmatpush.bf16.msrb.mxu2 %v573_v32 }
 0x2c7   :  { %617 = vmatpush.bf16.msrb.mxu2 %v572_v35 }
 0x2cb   :  { %618 = vmatpush.bf16.msrb.mxu2 %v571_v38 }
 0x2cf   :  { %619 = vmatpush.bf16.msrb.mxu2 %v570_v0  ;;  %v1059_v0 = vld [vmem:[%s1497_s7 + $0x20] sm:$0xff] }
 0x2d3   :  { %620 = vmatpush.bf16.msrb.mxu2 %v569_v54 }
 0x2d6   :  { %621 = vmatmul.bf16.vlgmr.msrb.gmra.mxu2 %v1053_v39 }
 0x2e6   :  { %626 = vmatmul.bf16.gmra.mxu2 %v1054_v40 }
 0x32c   :  { %v594_v46 = vpop.permute.xlu0 %593 }
 0x359   :  { %v622_v41 = vpop.f32.mrf.mxu2 }
 0x35a   :  { %v623_v53 = vadd.f32 %v622_v41, %v584_v52  ;;  %v670_v41 = vpop.permute.xlu2 %669 }
 0x35c   :  { %v632_v58 = vmax.f32 %v623_v53, 0.0 }
 0x361   :  { %v624_v42 = vpop.f32.mrf.mxu2 }
 0x362   :  { %v625_v50 = vadd.f32 %v624_v42, %v589_v48  ;;  %v826_v53 = vpop.permute.xlu2 %825 }
 0x364   :  { %v633_v56 = vmax.f32 %v625_v50, 0.0  ;;  %v821_v50 = vld [vmem:[%s1499_s9] sm:$0xff]  ;;  %s1109_s9 = smov [#allocation2]  }
 0x365   :  { %s914_s21 = sshll.u32 %s1109_s9, 4  ;;  %s915_s21 = int_to_ptr.vmem [resolvable:$true] %s914_s21 }
 0x366   :  { %v648_v59 = vpack.c.bf16 %v633_v56, %v632_v58 }
 0x369   :  { %v627_v45 = vpop.f32.mrf.mxu2 }
 0x36a   :  { %v628_v47 = vadd.f32 %v627_v45, %v594_v46  ;;  %v665_v45 = vpop.permute.xlu1 %664 }
 0x36c   :  { %v634_v55 = vmax.f32 %v628_v47, 0.0 }
 0x371   :  { %v629_v49 = vpop.f32.mrf.mxu2 }
 0x372   :  { %v630_v51 = vadd.f32 %v629_v49, %v599_v44 }
 0x374   :  { %v635_v54 = vmax.f32 %v630_v51, 0.0  ;;  %v852_v51 = vlaneseq }
 0x376   :  { %v649_v57 = vpack.c.bf16 %v635_v54, %v634_v55  ;;  %v1479_v52 = vshrl.u32 %v852_v51, 7 }
 0x378   :  { %776 = vmatpush.bf16.msra.mxu3 %v649_v57  ;;  %vm854_vm2 = vcmp.lt.s32.totalorder %v1479_v52, 6  ;;  %vm905_vm10 = vcmp.eq.s32.totalorder %v1479_v52, 6 }
 0x37c   :  { %777 = vmatpush.bf16.msra.mxu3 %v648_v59 }
 0x37f   :  { %1029 = vmatmul.msk.bf16.vlgmr.msra.gmra.mxu3 %vm242_vm0, %v1055_v60 }
 0x38f   :  { %1030 = vmatmul.msk.bf16.gmra.mxu3 %vm242_vm0, %v1056_v61 }
 0x39f   :  { %1031 = vmatmul.msk.bf16.gmra.mxu3 %vm242_vm0, %v1057_v62 }
 0x3af   :  { %1032 = vmatmul.msk.bf16.gmra.mxu3 %vm242_vm0, %v1058_v63 }
 0x3bf   :  { %1033 = vmatmul.msk.bf16.gmra.mxu3 %vm242_vm0, %v1059_v0 }
 0x3cf   :  { %1034 = vmatmul.msk.bf16.gmra.mxu3 %vm242_vm0, %v1060_v1 }
 0x402   :  { %v779_v2 = vpop.f32.mrf.mxu3 }
 0x403   :  { %v780_v46 = vadd.f32 %v779_v2, %v665_v45 }
 0x405   :  { %v809_v49 = vmax.f32 %v780_v46, 0.0 }
 0x40a   :  { %v781_v3 = vpop.f32.mrf.mxu3 }
 0x40b   :  { %v782_v42 = vadd.f32 %v781_v3, %v670_v41 }
 0x40d   :  { %v810_v48 = vmax.f32 %v782_v42, 0.0 }
 0x412   :  { %v784_v4 = vpop.f32.mrf.mxu3 }
 0x413   :  { %v785_v39 = vadd.f32 %v784_v4, %v675_v33 }
 0x415   :  { %v811_v47 = vmax.f32 %v785_v39, 0.0 }
 0x41a   :  { %v786_v5 = vpop.f32.mrf.mxu3 }
 0x41b   :  { %v787_v37 = vadd.f32 %v786_v5, %v680_v30 }
 0x41d   :  { %v812_v44 = vmax.f32 %v787_v37, 0.0 }
 0x422   :  { %v789_v6 = vpop.f32.mrf.mxu3 }
 0x423   :  { %v790_v35 = vadd.f32 %v789_v6, %v685_v11 }
 0x425   :  { %v813_v40 = vmax.f32 %v790_v35, 0.0 }
 0x42a   :  { %v791_v9 = vpop.f32.mrf.mxu3 }
 0x42b   :  { %v792_v34 = vadd.f32 %v791_v9, %v690_v8 }
 0x42d   :  { %v814_v38 = vmax.f32 %v792_v34, 0.0 }
 0x432   :  { %v794_v10 = vpop.f32.mrf.mxu3 }
 0x433   :  { %v795_v31 = vadd.f32 %v794_v10, %v695_v12 }
 0x435   :  { %v815_v36 = vmax.f32 %v795_v31, 0.0 }
 0x43a   :  { %v796_v14 = vpop.f32.mrf.mxu3 }
 0x43b   :  { %v797_v28 = vadd.f32 %v796_v14, %v700_v7 }
 0x43d   :  { %v816_v43 = vmax.f32 %v797_v28, 0.0 }
 0x442   :  { %v799_v19 = vpop.f32.mrf.mxu3 }
 0x443   :  { %v800_v26 = vadd.f32 %v799_v19, %v705_v22 }
 0x445   :  { %v817_v32 = vmax.f32 %v800_v26, 0.0 }
 0x44a   :  { %v801_v23 = vpop.f32.mrf.mxu3 }
 0x44b   :  { %v802_v18 = vadd.f32 %v801_v23, %v710_v21 }
 0x44d   :  { %v818_v29 = vmax.f32 %v802_v18, 0.0 }
 0x452   :  { %v804_v24 = vpop.f32.mrf.mxu3 }
 0x453   :  { %v805_v16 = vadd.f32 %v804_v24, %v715_v17 }
 0x455   :  { %v819_v27 = vmax.f32 %v805_v16, 0.0 }
 0x45a   :  { %v806_v25 = vpop.f32.mrf.mxu3 }
 0x45b   :  { %v807_v15 = vadd.f32 %v806_v25, %v720_v13 }
 0x45d   :  { %v820_v20 = vmax.f32 %v807_v15, 0.0 }
 0x45f   :  { %836 = vmatpush.msra.mxu2 %v820_v20 }
 0x461   :  { %837 = vmatpush.msra.mxu2 %v819_v27 }
 0x463   :  { %838 = vmatpush.msra.mxu2 %v818_v29 }
 0x465   :  { %839 = vmatpush.msra.mxu2 %v817_v32 }
 0x467   :  { %840 = vmatpush.msra.mxu2 %v816_v43 }
 0x469   :  { %841 = vmatpush.msra.mxu2 %v815_v36 }
 0x46b   :  { %842 = vmatpush.msra.mxu2 %v814_v38 }
 0x46d   :  { %843 = vmatpush.msra.mxu2 %v813_v40 }
 0x46f   :  { %844 = vmatpush.msra.mxu2 %v812_v44 }
 0x471   :  { %845 = vmatpush.msra.mxu2 %v811_v47 }
 0x473   :  { %846 = vmatpush.msra.mxu2 %v810_v48 }
 0x475   :  { %847 = vmatpush.msra.mxu2 %v809_v49 }
 0x476   :  { %1035 = vmatmul.msk.f32.vlgmr.msra.gmra.mxu2 %vm828_vm1, %v821_v50 }
 0x4f9   :  { %v849_v55 = vpop.f32.mrf.mxu2 }
 0x4fa   :  { %v850_v54 = vadd.f32 %v849_v55, %v826_v53 }
 0x4fc   :  { %v855_v56 = vsel %vm854_vm2, %v850_v54, -1e+30  ;;  %v1036_v60 = vmul.f32 -1.442695, %v850_v54 }
 0x4fd   :  { %v856_v57 = vrot.slane %v855_v56, 4 }
 0x4fe   :  { %1074 = vpow2.f32 %v1036_v60 }
 0x4ff   :  { %v857_v58 = vmax.f32 %v855_v56, %v856_v57 }
 0x501   :  { %v858_v59 = vrot.slane %v857_v58, 2 }
 0x503   :  { %v859_v61 = vmax.f32 %v857_v58, %v858_v59 }
 0x504   :  { %v1075_v2 = vpop.eup %1074 }
 0x505   :  { %v860_v62 = vrot.slane %v859_v61, 1  ;;  %v889_v3 = vadd.f32 1.0, %v1075_v2 }
 0x507   :  { %v861_v63 = vmax.f32 %v859_v61, %v860_v62  ;;  %v901_v24 = vand.u32 2147483648, %v889_v3  ;;  %vm895_vm4 = vweird.f32 %v889_v3  ;;  %v899_v11 = vand.u32 2147483647, %v889_v3 }
 0x509   :  { %v862_v0 = vsub.f32 %v855_v56, %v861_v63  ;;  %v902_v20 = vor.u32 1.1754944e-38, %v901_v24  ;;  %vm900_vm8 = vcmp.eq.f32.partialorder %v899_v11, 8.507059e+37 }
 0x50b   :  { %v863_v1 = vmul.f32 1.442695, %v862_v0 }
 0x50d   :  { %1076 = vpow2.f32 %v863_v1 }
 0x50e   :  { %1078 = vrcp.f32 %v889_v3 }
 0x513   :  { %v1077_v4 = vpop.eup %1076 }
 0x514   :  { %v865_v5 = vrot.slane %v1077_v4, 4  ;;  %v1079_v10 = vpop.eup %1078 }
 0x515   :  { %v891_v14 = vmul.f32 %v1079_v10, %v889_v3  ;;  %vm896_vm3 = vweird.f32 %v1079_v10 }
 0x516   :  { %v866_v6 = vadd.f32 %v1077_v4, %v865_v5  ;;  %vm897_vm5 = vmor %vm895_vm4, %vm896_vm3 }
 0x517   :  { %v892_v21 = vsub.f32 1.0, %v891_v14 }
 0x518   :  { %v867_v9 = vrot.slane %v866_v6, 2 }
 0x519   :  { %v893_v22 = vmul.f32 %v1079_v10, %v892_v21 }
 0x51a   :  { %v868_v13 = vadd.f32 %v867_v9, %v866_v6 }
 0x51b   :  { %v894_v12 = vadd.f32 %v1079_v10, %v893_v22 }
 0x51c   :  { %v869_v17 = vrot.slane %v868_v13, 1 }
 0x51d   :  { %v898_v18 = vsel %vm897_vm5, %v1079_v10, %v894_v12 }
 0x51e   :  { %v870_v19 = vadd.f32 %v869_v17, %v868_v13  ;;  %v903_v28 = vsel %vm900_vm8, %v902_v20, %v898_v18 }
 0x51f   :  { %v906_v32 = vsel %vm905_vm10, %v903_v28, %v850_v54 }
 0x520   :  { %1080 = vrcp.f32 %v870_v19  ;;  %v882_v25 = vand.u32 2147483648, %v870_v19  ;;  %v880_v15 = vand.u32 2147483647, %v870_v19  ;;  %vm876_vm7 = vweird.f32 %v870_v19 }
 0x522   :  { %v883_v27 = vor.u32 1.1754944e-38, %v882_v25  ;;  %vm881_vm11 = vcmp.eq.f32.partialorder %v880_v15, 8.507059e+37 }
 0x526   :  { %v1081_v23 = vpop.eup %1080 }
 0x527   :  { %v872_v7 = vmul.f32 %v1081_v23, %v870_v19  ;;  %vm877_vm6 = vweird.f32 %v1081_v23 }
 0x528   :  { %vm878_vm9 = vmor %vm876_vm7, %vm877_vm6 }
 0x529   :  { %v873_v8 = vsub.f32 1.0, %v872_v7 }
 0x52b   :  { %v874_v16 = vmul.f32 %v1081_v23, %v873_v8 }
 0x52d   :  { %v875_v26 = vadd.f32 %v1081_v23, %v874_v16 }
 0x52f   :  { %v879_v29 = vsel %vm878_vm9, %v1081_v23, %v875_v26 }
 0x530   :  { %v884_v30 = vsel %vm881_vm11, %v883_v27, %v879_v29 }
 0x531   :  { %v885_v31 = vmul.f32 %v1077_v4, %v884_v30 }
 0x533   :  { %v907_v33 = vsel %vm854_vm2, %v885_v31, %v906_v32 }
 0x534   :  { %908 = vst [vmem:[#allocation2] sm:$0xff] %v907_v33 }
 0x535   :  { %919 = dma.vmem_to_hbm [thread:$0]  %s915_s21, 128, %s917_s24, [#allocation3]  }
 0x536   :  { %1106 = dma.done.wait [#allocation3], 128  }
 0x537   :  { %1107 = vsyncadd [#allocation3], 4294967168 }
 0x538   :  { %924 = vsyncpa [#allocation3], 1 }

</bundles_post_ra>
